<compile_context>
chip_gen: v5e
topology: v5e:2x2
jax: 0.10.0
libtpu: 0.0.40
codegen_flags: <defaults>
</compile_context>

<pallas_src>
import jax
import jax.numpy as jnp
from jax.experimental import pallas as pl
from jax.experimental.pallas import tpu as pltpu


def transition_kernel(sb_ref, w_ref, x_ref, o_ref):
    # sb_ref: (2, Cin) f32   -- row 0 = BN scale, row 1 = BN bias (inference fused)
    # w_ref : (Cin, Cout) bf16 -- 1x1 conv weight with the 0.25 pool factor folded in
    # x_ref : (4, TILE_P, Cin) bf16 -- leading 4 = the 2x2 pooling-window elements
    # o_ref : (TILE_P, Cout) f32
    sb = sb_ref[...]
    scale = sb[0:1]                                    # (1, Cin)
    bias = sb[1:2]                                     # (1, Cin)

    x = x_ref[...].astype(jnp.float32)                 # (4, TILE_P, Cin)
    y = jnp.maximum(x * scale + bias, 0.0)             # BN (inference) + ReLU, f32 VPU

    # 2x2 average pool == sum over the window axis (0.25 already folded into w).
    pooled = y[0] + y[1] + y[2] + y[3]                 # (TILE_P, Cin), f32

    # 1x1 conv == matmul over channels; bf16 operands, f32 accumulation on MXU.
    z = jnp.dot(pooled.astype(jnp.bfloat16), w_ref[...],
                preferred_element_type=jnp.float32)    # (TILE_P, Cout)
    o_ref[...] = z.astype(o_ref.dtype)


def _pick_pixel_tile(total, target=512):
    """Largest divisor of `total` that is <= target (prefer multiples of 8)."""
    if total <= target:
        return total
    fallback = 1
    for t in range(target, 0, -1):
        if total % t == 0:
            if t % 8 == 0:
                return t
            fallback = max(fallback, t)
    return fallback


def transition_forward(x_nchw, gamma, beta, run_mean, run_var, conv_w, eps=1e-5):
    N, Cin, H, W = x_nchw.shape
    Cout = conv_w.shape[0]
    assert H % 2 == 0 and W % 2 == 0  # TODO(synk): odd H/W (PyTorch floors) not handled
    Ho, Wo = H // 2, W // 2
    P = Ho * Wo
    tile_p = _pick_pixel_tile(P)

    # Fuse BN (inference mode, running stats) into per-channel scale / bias.
    inv_std = 1.0 / jnp.sqrt(run_var.astype(jnp.float32) + eps)
    scale = gamma.astype(jnp.float32) * inv_std
    bias = beta.astype(jnp.float32) - run_mean.astype(jnp.float32) * scale
    sb = jnp.stack([scale, bias], axis=0)              # (2, Cin) single operand

    # conv weight (Cout, Cin, 1, 1) -> (Cin, Cout); fold in the 2x2-avg 0.25.
    w = (conv_w.reshape(Cout, Cin).T.astype(jnp.float32) * 0.25).astype(jnp.bfloat16)

    # NCHW -> (N, window=4, pixel=Ho*Wo, Cin), done once in the wrapper, in bf16.
    x_b = x_nchw.astype(jnp.bfloat16)
    x_pool = jnp.transpose(
        x_b.reshape(N, Cin, Ho, 2, Wo, 2), (0, 3, 5, 2, 4, 1)
    ).reshape(N, 4, P, Cin)

    cost = pl.CostEstimate(
        flops=int(2 * N * P * Cin * Cout + 5 * N * H * W * Cin),
        transcendentals=0,
        bytes_accessed=int(x_pool.size * 2 + N * P * Cout * 4
                           + sb.size * 4 + w.size * 2),
    )

    out_flat = pl.pallas_call(
        transition_kernel,
        out_shape=jax.ShapeDtypeStruct((N, P, Cout), jnp.float32),
        grid_spec=pltpu.PrefetchScalarGridSpec(
            num_scalar_prefetch=0,
            grid=(N, P // tile_p),
            in_specs=[
                pl.BlockSpec((2, Cin), lambda b, p: (0, 0)),      # fused BN scale/bias
                pl.BlockSpec((Cin, Cout), lambda b, p: (0, 0)),   # conv weight (w/ 0.25)
                pl.BlockSpec((None, 4, tile_p, Cin), lambda b, p: (b, 0, p, 0)),
            ],
            out_specs=pl.BlockSpec((None, tile_p, Cout), lambda b, p: (b, p, 0)),
        ),
        compiler_params=pltpu.CompilerParams(
            dimension_semantics=("parallel", "parallel"),
        ),
        cost_estimate=cost,
    )(sb, w, x_pool)

    out_nhwc = out_flat.reshape(N, Ho, Wo, Cout)
    return jnp.transpose(out_nhwc, (0, 3, 1, 2))       # back to NCHW


def transition_reference(x, gamma, beta, run_mean, run_var, conv_w, eps=1e-5):
    # plain-JAX f32 reference (NCHW), for correctness check
    inv_std = 1.0 / jnp.sqrt(run_var + eps)
    xn = (x - run_mean[None, :, None, None]) * inv_std[None, :, None, None]
    xn = xn * gamma[None, :, None, None] + beta[None, :, None, None]
    xr = jnp.maximum(xn, 0.0)
    y = jnp.einsum("nchw,oc->nohw", xr,
                   conv_w.reshape(conv_w.shape[0], conv_w.shape[1]))
    N, Co, H, W = y.shape
    y = y.reshape(N, Co, H // 2, 2, W // 2, 2).mean(axis=(3, 5))
    return y


if __name__ == "__main__":
    key = jax.random.PRNGKey(0)
    N, Cin, H, W = 2, 4, 16, 16
    Cout = 2   # DenseNet transition typically halves the channel count

    k = jax.random.split(key, 6)
    x = jax.random.normal(k[0], (N, Cin, H, W), dtype=jnp.float32)
    gamma = jax.random.normal(k[1], (Cin,), dtype=jnp.float32) * 0.1 + 1.0
    beta = jax.random.normal(k[2], (Cin,), dtype=jnp.float32) * 0.1
    run_mean = jax.random.normal(k[3], (Cin,), dtype=jnp.float32) * 0.1
    run_var = jnp.abs(jax.random.normal(k[4], (Cin,), dtype=jnp.float32)) * 0.1 + 1.0
    conv_w = jax.random.normal(k[5], (Cout, Cin, 1, 1), dtype=jnp.float32) * 0.5

    out = transition_forward(x, gamma, beta, run_mean, run_var, conv_w)
    out = jax.block_until_ready(out)

    ref = transition_reference(x, gamma, beta, run_mean, run_var, conv_w)
    assert out.shape == (N, Cout, H // 2, W // 2), out.shape
    # bf16 activations/weights in the kernel vs f32 reference -> bf16-level tolerance
    assert jnp.allclose(out, ref, atol=5e-2, rtol=5e-2), float(jnp.max(jnp.abs(out - ref)))

    print("KERNEL_OK")
</pallas_src>

<mosaic_0001>
module attributes {stable_mosaic.version = 11 : i64} {
  func.func @transition_kernel(%arg0: i32, %arg1: i32, %arg2: memref<2x4xf32, #tpu.memory_space<vmem>>, %arg3: memref<4x2xbf16, #tpu.memory_space<vmem>>, %arg4: memref<1x4x64x4xbf16, #tpu.memory_space<vmem>>, %arg5: memref<1x64x2xf32, #tpu.memory_space<vmem>>) attributes {dimension_semantics = [#tpu.dimension_semantics<parallel>, #tpu.dimension_semantics<parallel>], iteration_bounds = array<i64: 2, 1>, scalar_prefetch = 0 : i64, scratch_operands = 0 : i64, tpu.core_type = #tpu.core_type<tc>, window_params = [{pipeline_mode = #tpu.pipeline_mode<synchronous>, transform_indices = @transform_0, window_bounds = array<i64: 2, 4>}, {pipeline_mode = #tpu.pipeline_mode<synchronous>, transform_indices = @transform_1, window_bounds = array<i64: 4, 2>}, {transform_indices = @transform_2, window_bounds = array<i64: 1, 4, 64, 4>}, {transform_indices = @transform_3, window_bounds = array<i64: 1, 64, 2>}]} {
    %c0 = arith.constant 0 : index
    %c0_0 = arith.constant 0 : index
    %0 = vector.load %arg2[%c0, %c0_0] : memref<2x4xf32, #tpu.memory_space<vmem>>, vector<2x4xf32>
    %1 = vector.extract_strided_slice %0 {offsets = [0, 0], sizes = [1, 4], strides = [1, 1]} : vector<2x4xf32> to vector<1x4xf32>
    %2 = vector.extract_strided_slice %0 {offsets = [1, 0], sizes = [1, 4], strides = [1, 1]} : vector<2x4xf32> to vector<1x4xf32>
    %c0_1 = arith.constant 0 : index
    %c0_2 = arith.constant 0 : index
    %c0_3 = arith.constant 0 : index
    %c0_4 = arith.constant 0 : index
    %3 = vector.load %arg4[%c0_1, %c0_2, %c0_3, %c0_4] : memref<1x4x64x4xbf16, #tpu.memory_space<vmem>>, vector<1x4x64x4xbf16>
    %4 = vector.shape_cast %3 : vector<1x4x64x4xbf16> to vector<4x64x4xbf16>
    %5 = arith.extf %4 : vector<4x64x4xbf16> to vector<4x64x4xf32>
    %6 = vector.shape_cast %1 : vector<1x4xf32> to vector<1x1x4xf32>
    %7 = vector.broadcast %6 : vector<1x1x4xf32> to vector<4x64x4xf32>
    %8 = arith.mulf %5, %7 : vector<4x64x4xf32>
    %9 = vector.shape_cast %2 : vector<1x4xf32> to vector<1x1x4xf32>
    %10 = vector.broadcast %9 : vector<1x1x4xf32> to vector<4x64x4xf32>
    %11 = arith.addf %8, %10 : vector<4x64x4xf32>
    %cst = arith.constant 0.000000e+00 : f32
    %12 = vector.broadcast %cst : f32 to vector<4x64x4xf32>
    %13 = arith.maximumf %11, %12 : vector<4x64x4xf32>
    %14 = vector.extract_strided_slice %13 {offsets = [0, 0, 0], sizes = [1, 64, 4], strides = [1, 1, 1]} : vector<4x64x4xf32> to vector<1x64x4xf32>
    %15 = vector.shape_cast %14 : vector<1x64x4xf32> to vector<64x4xf32>
    %16 = vector.extract_strided_slice %13 {offsets = [1, 0, 0], sizes = [1, 64, 4], strides = [1, 1, 1]} : vector<4x64x4xf32> to vector<1x64x4xf32>
    %17 = vector.shape_cast %16 : vector<1x64x4xf32> to vector<64x4xf32>
    %18 = arith.addf %15, %17 : vector<64x4xf32>
    %19 = vector.extract_strided_slice %13 {offsets = [2, 0, 0], sizes = [1, 64, 4], strides = [1, 1, 1]} : vector<4x64x4xf32> to vector<1x64x4xf32>
    %20 = vector.shape_cast %19 : vector<1x64x4xf32> to vector<64x4xf32>
    %21 = arith.addf %18, %20 : vector<64x4xf32>
    %22 = vector.extract_strided_slice %13 {offsets = [3, 0, 0], sizes = [1, 64, 4], strides = [1, 1, 1]} : vector<4x64x4xf32> to vector<1x64x4xf32>
    %23 = vector.shape_cast %22 : vector<1x64x4xf32> to vector<64x4xf32>
    %24 = arith.addf %21, %23 : vector<64x4xf32>
    %25 = arith.truncf %24 : vector<64x4xf32> to vector<64x4xbf16>
    %c0_5 = arith.constant 0 : index
    %c0_6 = arith.constant 0 : index
    %26 = vector.load %arg3[%c0_5, %c0_6] : memref<4x2xbf16, #tpu.memory_space<vmem>>, vector<4x2xbf16>
    %cst_7 = arith.constant dense<0.000000e+00> : vector<64x2xf32>
    %27 = tpu.matmul %25, %26, %cst_7 {dimension_numbers = #tpu.dot_dimension_numbers<[1], [0], [0], [1], [0, 0, 1, 1], [], []>} : vector<64x4xbf16>, vector<4x2xbf16>, vector<64x2xf32> -> vector<64x2xf32>
    %c0_8 = arith.constant 0 : index
    %c0_9 = arith.constant 0 : index
    %c0_10 = arith.constant 0 : index
    %28 = vector.load %arg5[%c0_8, %c0_9, %c0_10] : memref<1x64x2xf32, #tpu.memory_space<vmem>>, vector<1x64x2xf32>
    %29 = vector.shape_cast %28 : vector<1x64x2xf32> to vector<64x2xf32>
    %30 = vector.shape_cast %27 : vector<64x2xf32> to vector<1x64x2xf32>
    tpu.vector_store %arg5[%c0_8, %c0_9, %c0_10], %30 {strides = array<i32>} : memref<1x64x2xf32, #tpu.memory_space<vmem>>, vector<1x64x2xf32>,
    return
  }
  func.func @transform_0(%arg0: i32, %arg1: i32) -> (i32, i32) {
    %c0_i32 = arith.constant 0 : i32
    %c0_i32_0 = arith.constant 0 : i32
    %c0_i32_1 = arith.constant 0 : i32
    return %c0_i32, %c0_i32_0 : i32, i32
  }
  func.func @transform_1(%arg0: i32, %arg1: i32) -> (i32, i32) {
    %c0_i32 = arith.constant 0 : i32
    %c0_i32_0 = arith.constant 0 : i32
    %c0_i32_1 = arith.constant 0 : i32
    return %c0_i32, %c0_i32_0 : i32, i32
  }
  func.func @transform_2(%arg0: i32, %arg1: i32) -> (i32, i32, i32, i32) {
    %c0_i32 = arith.constant 0 : i32
    %c0_i32_0 = arith.constant 0 : i32
    %c0_i32_1 = arith.constant 0 : i32
    return %arg0, %c0_i32, %arg1, %c0_i32_0 : i32, i32, i32, i32
  }
  func.func @transform_3(%arg0: i32, %arg1: i32) -> (i32, i32, i32) {
    %c0_i32 = arith.constant 0 : i32
    %c0_i32_0 = arith.constant 0 : i32
    return %arg0, %arg1, %c0_i32 : i32, i32, i32
  }
}

</mosaic_0001>

<bundles_post_ra>
// kernel: tpu_custom_call.1
= control target key start
LH: loop header
LB: loop body
LE: loop exit
PB: predicated region body
PF: predicated region fallthrough
CT: control target
= control target key end

     0   :  { %s712_s12 = smov 0   ;;  %s714_s13 = smov 0   ;;  %s853_s0 = inlined_call_operand.vmem [shape: f32[2,4], index: 0, kind: input, shape index: {}]   ;;  %s854_s1 = inlined_call_operand.vmem [shape: bf16[4,2], index: 1, kind: input, shape index: {}]   ;;  %s855_s2 = inlined_call_operand.vmem [shape: bf16[2,4,64,4], index: 2, kind: input, shape index: {}]   ;;  %s856_s3 = inlined_call_operand.vmem [shape: f32[2,64,2], index: 3, kind: output, shape index: {}]  }
   0x1   :  { %s716_s14 = smov 0  }
   0x2 LB: > { %s25_s15 = sadd.s32 1, %s686_s13  ;;  %p549_p0 = scmp.ge.s32.totalorder %s690_s14, 1  ;;  %s690_s14 = sphi %s716_s14, %s13_s14   ;;  %s686_s13 = sphi %s714_s13, %s858_s13   ;;  %s682_s12 = sphi %s712_s12, %s857_s12  }
   0x3   : > { %p27_p1 = scmp.ge.s32.totalorder %s25_s15, 2  ;;  %p158_p2 = scmp.lt.s32.totalorder %s690_s14, 3 }
   0x5   : > { %s860_s15 = smov (%p27_p1, %s25_s15), 0  ;;  %p159_p3 = pnand %p549_p0, %p158_p2 }
   0x6   : > { %p191_p4 = scmp.lt.s32.totalorder (!%p159_p3), %s682_s12, 1 }
   0x7   : > { %162 = sbr.rel (%p159_p3) target bundleno = 203 (0xcb), region = 32 }
   0xc   : > { %v402_v0 = vld [vmem:[%s854_s1] sm:$0x3]  ;;  %vm416_vm0 = vcmask 1041408   ;;  %s862_s12 = smov (!%p191_p4, %s682_s12), 1  ;;  %vm403_vm1 = vcmask 31744   ;;  %vm449_vm2 = vcmask 15360  }
   0xd   : > { %v418_v1 = vsel %vm416_vm0, %v402_v0, 0  ;;  %v211_v2 = vld [vmem:[%s853_s0] sm:$0x3]  ;;  %s560_s20 = sshll.u32 %s862_s12, 7  ;;  %s561_s24 = sshll.u32 %s862_s12, 6 }
   0xe   : > { %427 = vmatpush.bf16.msra.mxu0 %v418_v1  ;;  %641 = vmatpush.bf16.msra.mxu1 %v418_v1  ;;  %s742_s23 = scalar_lea.vmem %s855_s2, %s560_s20  ;;  %v744_v3 = vperm.slane %v211_v2, 0  ;;  %v749_v7 = vperm.slane %v211_v2, 1  ;;  %s208_s27 = scalar_lea.vmem %s856_s3, %s561_s24 }
   0xf   : > { %642 = vmatpush.bf16.msra.mxu2 %v418_v1  ;;  %643 = vmatpush.bf16.msra.mxu3 %v418_v1  ;;  %v563_v4 = vld [vmem:[%s742_s23] sm:$0xff]   ;;  %v626_v33 = vld [vmem:[%s742_s23 + $0x8] sm:$0xff]  }
  0x10   : > { %v629_v5 = vld [vmem:[%s742_s23 + $0x20] sm:$0xff]   ;;  %v564_v8 = vunpack.c.l.bf16 %v563_v4  ;;  %v565_v9 = vunpack.c.h.bf16 %v563_v4  ;;  %v630_v38 = vld [vmem:[%s742_s23 + $0x28] sm:$0xff]   ;;  %v568_v47 = vunpack.c.l.bf16 %v626_v33  ;;  %v569_v48 = vunpack.c.h.bf16 %v626_v33 }
  0x11   : > { %v633_v6 = vld [vmem:[%s742_s23 + $0x40] sm:$0xff]   ;;  %v580_v10 = vunpack.c.l.bf16 %v629_v5  ;;  %v581_v11 = vunpack.c.h.bf16 %v629_v5  ;;  %v634_v39 = vld [vmem:[%s742_s23 + $0x48] sm:$0xff]   ;;  %v584_v49 = vunpack.c.l.bf16 %v630_v38  ;;  %v585_v50 = vunpack.c.h.bf16 %v630_v38 }
  0x12   : > { %v637_v12 = vld [vmem:[%s742_s23 + $0x60] sm:$0xff]   ;;  %v596_v13 = vunpack.c.l.bf16 %v633_v6  ;;  %v597_v14 = vunpack.c.h.bf16 %v633_v6  ;;  %v277_v17 = vmul.f32 %v564_v8, %v744_v3  ;;  %v278_v18 = vmul.f32 %v565_v9, %v744_v3  ;;  %v638_v44 = vld [vmem:[%s742_s23 + $0x68] sm:$0xff]  }
  0x13   : > { %v612_v15 = vunpack.c.l.bf16 %v637_v12  ;;  %v613_v16 = vunpack.c.h.bf16 %v637_v12  ;;  %v285_v19 = vmul.f32 %v580_v10, %v744_v3  ;;  %v286_v20 = vmul.f32 %v581_v11, %v744_v3  ;;  %v627_v11 = vld [vmem:[%s742_s23 + $0x10] sm:$0xff]  }
  0x14   : > { %v293_v21 = vmul.f32 %v596_v13, %v744_v3  ;;  %v294_v22 = vmul.f32 %v597_v14, %v744_v3  ;;  %v310_v25 = vadd.f32 %v749_v7, %v277_v17  ;;  %v311_v26 = vadd.f32 %v749_v7, %v278_v18 }
  0x15   : > { %v301_v23 = vmul.f32 %v612_v15, %v744_v3  ;;  %v302_v24 = vmul.f32 %v613_v16, %v744_v3  ;;  %v318_v27 = vadd.f32 %v749_v7, %v285_v19  ;;  %v319_v28 = vadd.f32 %v749_v7, %v286_v20  ;;  %v631_v16 = vld [vmem:[%s742_s23 + $0x30] sm:$0xff]  }
  0x16   : > { %v326_v29 = vadd.f32 %v749_v7, %v293_v21  ;;  %v327_v30 = vadd.f32 %v749_v7, %v294_v22  ;;  %v342_v34 = vmax.f32 %v310_v25, 0.0  ;;  %v343_v35 = vmax.f32 %v311_v26, 0.0  ;;  %v635_v21 = vld [vmem:[%s742_s23 + $0x50] sm:$0xff]  }
  0x17   : > { %v334_v31 = vadd.f32 %v749_v7, %v301_v23  ;;  %v335_v32 = vadd.f32 %v749_v7, %v302_v24  ;;  %v350_v36 = vmax.f32 %v318_v27, 0.0  ;;  %v351_v37 = vmax.f32 %v319_v28, 0.0  ;;  %v639_v22 = vld [vmem:[%s742_s23 + $0x70] sm:$0xff]  }
  0x18   : > { %v358_v40 = vmax.f32 %v326_v29, 0.0  ;;  %v359_v41 = vmax.f32 %v327_v30, 0.0  ;;  %v600_v51 = vunpack.c.l.bf16 %v634_v39  ;;  %v601_v52 = vunpack.c.h.bf16 %v634_v39 }
  0x19   : > { %v366_v42 = vmax.f32 %v334_v31, 0.0  ;;  %v367_v43 = vmax.f32 %v335_v32, 0.0  ;;  %v374_v45 = vadd.f32 %v350_v36, %v342_v34  ;;  %v375_v46 = vadd.f32 %v351_v37, %v343_v35 }
  0x1a   : > { %v616_v55 = vunpack.c.l.bf16 %v638_v44  ;;  %v617_v56 = vunpack.c.h.bf16 %v638_v44  ;;  %v279_v57 = vmul.f32 %v568_v47, %v744_v3  ;;  %v280_v58 = vmul.f32 %v569_v48, %v744_v3 }
  0x1b   : > { %v382_v53 = vadd.f32 %v374_v45, %v358_v40  ;;  %v383_v54 = vadd.f32 %v375_v46, %v359_v41  ;;  %v287_v59 = vmul.f32 %v584_v49, %v744_v3  ;;  %v288_v60 = vmul.f32 %v585_v50, %v744_v3 }
  0x1c   : > { %v295_v63 = vmul.f32 %v600_v51, %v744_v3  ;;  %v296_v0 = vmul.f32 %v601_v52, %v744_v3  ;;  %v303_v1 = vmul.f32 %v616_v55, %v744_v3  ;;  %v304_v2 = vmul.f32 %v617_v56, %v744_v3  ;;  %v628_v55 = vld [vmem:[%s742_s23 + $0x18] sm:$0xff]  }
  0x1d   : > { %v390_v61 = vadd.f32 %v382_v53, %v366_v42  ;;  %v391_v62 = vadd.f32 %v383_v54, %v367_v43  ;;  %v312_v4 = vadd.f32 %v749_v7, %v279_v57  ;;  %v313_v5 = vadd.f32 %v749_v7, %v280_v58 }
  0x1e   : > { %v320_v8 = vadd.f32 %v749_v7, %v287_v59  ;;  %v321_v9 = vadd.f32 %v749_v7, %v288_v60  ;;  %v328_v10 = vadd.f32 %v749_v7, %v295_v63  ;;  %v329_v12 = vadd.f32 %v749_v7, %v296_v0  ;;  %v632_v60 = vld [vmem:[%s742_s23 + $0x38] sm:$0xff]  }
  0x1f   : > { %v398_v6 = vpack.c.bf16 %v391_v62, %v390_v61  ;;  %v336_v13 = vadd.f32 %v749_v7, %v303_v1  ;;  %v337_v14 = vadd.f32 %v749_v7, %v304_v2  ;;  %v344_v15 = vmax.f32 %v312_v4, 0.0  ;;  %v636_v1 = vld [vmem:[%s742_s23 + $0x58] sm:$0xff]  }
  0x20   : > { %v345_v17 = vmax.f32 %v313_v5, 0.0  ;;  %v352_v18 = vmax.f32 %v320_v8, 0.0  ;;  %v353_v19 = vmax.f32 %v321_v9, 0.0  ;;  %v360_v20 = vmax.f32 %v328_v10, 0.0  ;;  %v640_v2 = vld [vmem:[%s742_s23 + $0x78] sm:$0xff]  }
  0x21   : > { %554 = vmatmul.msk.bf16.vlgmr.msra.gmra.mxu0 %vm403_vm1, %v398_v6  ;;  %v361_v23 = vmax.f32 %v329_v12, 0.0  ;;  %v368_v24 = vmax.f32 %v336_v13, 0.0  ;;  %v369_v25 = vmax.f32 %v337_v14, 0.0  ;;  %v572_v26 = vunpack.c.l.bf16 %v627_v11 }
  0x22   : > { %v376_v27 = vadd.f32 %v352_v18, %v344_v15  ;;  %v377_v28 = vadd.f32 %v353_v19, %v345_v17  ;;  %v573_v29 = vunpack.c.h.bf16 %v627_v11  ;;  %v588_v30 = vunpack.c.l.bf16 %v631_v16 }
  0x23   : > { %v589_v31 = vunpack.c.h.bf16 %v631_v16  ;;  %v604_v32 = vunpack.c.l.bf16 %v635_v21  ;;  %v605_v33 = vunpack.c.h.bf16 %v635_v21  ;;  %v620_v34 = vunpack.c.l.bf16 %v639_v22 }
  0x24   : > { %v384_v35 = vadd.f32 %v376_v27, %v360_v20  ;;  %v385_v36 = vadd.f32 %v377_v28, %v361_v23  ;;  %v621_v37 = vunpack.c.h.bf16 %v639_v22  ;;  %v281_v38 = vmul.f32 %v572_v26, %v744_v3 }
  0x25   : > { %v282_v39 = vmul.f32 %v573_v29, %v744_v3  ;;  %v289_v40 = vmul.f32 %v588_v30, %v744_v3  ;;  %v290_v41 = vmul.f32 %v589_v31, %v744_v3  ;;  %v297_v42 = vmul.f32 %v604_v32, %v744_v3 }
  0x26   : > { %v392_v43 = vadd.f32 %v384_v35, %v368_v24  ;;  %v393_v44 = vadd.f32 %v385_v36, %v369_v25  ;;  %v298_v45 = vmul.f32 %v605_v33, %v744_v3  ;;  %v305_v46 = vmul.f32 %v620_v34, %v744_v3 }
  0x27   : > { %v306_v47 = vmul.f32 %v621_v37, %v744_v3  ;;  %v314_v48 = vadd.f32 %v749_v7, %v281_v38  ;;  %v315_v49 = vadd.f32 %v749_v7, %v282_v39  ;;  %v322_v50 = vadd.f32 %v749_v7, %v289_v40 }
  0x28   : > { %v399_v51 = vpack.c.bf16 %v393_v44, %v392_v43  ;;  %v323_v52 = vadd.f32 %v749_v7, %v290_v41  ;;  %v330_v53 = vadd.f32 %v749_v7, %v297_v42  ;;  %v331_v54 = vadd.f32 %v749_v7, %v298_v45 }
  0x29   : > { %v338_v56 = vadd.f32 %v749_v7, %v305_v46  ;;  %v339_v57 = vadd.f32 %v749_v7, %v306_v47  ;;  %v346_v58 = vmax.f32 %v314_v48, 0.0  ;;  %v347_v59 = vmax.f32 %v315_v49, 0.0 }
  0x2a   : > { %555 = vmatmul.msk.bf16.vlgmr.msra.gmra.mxu1 %vm403_vm1, %v399_v51  ;;  %v354_v61 = vmax.f32 %v322_v50, 0.0  ;;  %v355_v62 = vmax.f32 %v323_v52, 0.0  ;;  %v362_v63 = vmax.f32 %v330_v53, 0.0  ;;  %v363_v0 = vmax.f32 %v331_v54, 0.0 }
  0x2b   : > { %v370_v4 = vmax.f32 %v338_v56, 0.0  ;;  %v371_v5 = vmax.f32 %v339_v57, 0.0  ;;  %v576_v6 = vunpack.c.l.bf16 %v628_v55  ;;  %v577_v8 = vunpack.c.h.bf16 %v628_v55 }
  0x2c   : > { %v378_v9 = vadd.f32 %v354_v61, %v346_v58  ;;  %v379_v10 = vadd.f32 %v355_v62, %v347_v59  ;;  %v592_v11 = vunpack.c.l.bf16 %v632_v60  ;;  %v593_v12 = vunpack.c.h.bf16 %v632_v60 }
  0x2d   : > { %v608_v13 = vunpack.c.l.bf16 %v636_v1  ;;  %v609_v14 = vunpack.c.h.bf16 %v636_v1  ;;  %v624_v15 = vunpack.c.l.bf16 %v640_v2  ;;  %v625_v16 = vunpack.c.h.bf16 %v640_v2 }
  0x2e   : > { %v386_v17 = vadd.f32 %v378_v9, %v362_v63  ;;  %v387_v18 = vadd.f32 %v379_v10, %v363_v0  ;;  %v283_v19 = vmul.f32 %v576_v6, %v744_v3  ;;  %v284_v20 = vmul.f32 %v577_v8, %v744_v3 }
  0x2f   : > { %v291_v21 = vmul.f32 %v592_v11, %v744_v3  ;;  %v292_v22 = vmul.f32 %v593_v12, %v744_v3  ;;  %v299_v23 = vmul.f32 %v608_v13, %v744_v3  ;;  %v300_v24 = vmul.f32 %v609_v14, %v744_v3 }
  0x30   : > { %v394_v25 = vadd.f32 %v386_v17, %v370_v4  ;;  %v395_v26 = vadd.f32 %v387_v18, %v371_v5  ;;  %v307_v27 = vmul.f32 %v624_v15, %v744_v3  ;;  %v308_v28 = vmul.f32 %v625_v16, %v744_v3 }
  0x31   : > { %v316_v29 = vadd.f32 %v749_v7, %v283_v19  ;;  %v317_v30 = vadd.f32 %v749_v7, %v284_v20  ;;  %v324_v31 = vadd.f32 %v749_v7, %v291_v21  ;;  %v325_v32 = vadd.f32 %v749_v7, %v292_v22 }
  0x32   : > { %v400_v33 = vpack.c.bf16 %v395_v26, %v394_v25  ;;  %v332_v34 = vadd.f32 %v749_v7, %v299_v23  ;;  %v333_v35 = vadd.f32 %v749_v7, %v300_v24  ;;  %v340_v36 = vadd.f32 %v749_v7, %v307_v27 }
  0x33   : > { %v341_v37 = vadd.f32 %v749_v7, %v308_v28  ;;  %v348_v38 = vmax.f32 %v316_v29, 0.0  ;;  %v349_v39 = vmax.f32 %v317_v30, 0.0  ;;  %v356_v3 = vmax.f32 %v324_v31, 0.0 }
  0x34   : > { %556 = vmatmul.msk.bf16.vlgmr.msra.gmra.mxu2 %vm403_vm1, %v400_v33  ;;  %v357_v40 = vmax.f32 %v325_v32, 0.0  ;;  %v364_v41 = vmax.f32 %v332_v34, 0.0  ;;  %v365_v42 = vmax.f32 %v333_v35, 0.0  ;;  %v372_v43 = vmax.f32 %v340_v36, 0.0 }
  0x35   : > { %v380_v44 = vadd.f32 %v356_v3, %v348_v38  ;;  %v373_v45 = vmax.f32 %v341_v37, 0.0 }
  0x36   : > { %v381_v46 = vadd.f32 %v357_v40, %v349_v39 }
  0x37   : > { %v388_v47 = vadd.f32 %v380_v44, %v364_v41 }
  0x38   : > { %v389_v48 = vadd.f32 %v381_v46, %v365_v42 }
  0x39   : > { %v396_v49 = vadd.f32 %v388_v47, %v372_v43 }
  0x3a   : > { %v397_v50 = vadd.f32 %v389_v48, %v373_v45 }
  0x3c   : > { %v401_v51 = vpack.c.bf16 %v397_v50, %v396_v49 }
  0x3e   : > { %557 = vmatmul.msk.bf16.vlgmr.msra.gmra.mxu3 %vm403_vm1, %v401_v51 }
  0x9e   : > { %v429_v7 = vpop.f32.mrf.mxu0 }
  0x9f   : > { %450 = vst.msk [vmem:[%s208_s27] sm:$0xff] %vm449_vm2, %v429_v7 }
  0xa6   : > { %v431_v52 = vpop.f32.mrf.mxu0 }
  0xa7   : > { %451 = vst.msk [vmem:[%s208_s27 + $0x8] sm:$0xff] %vm449_vm2, %v431_v52  ;;  %v434_v53 = vpop.f32.mrf.mxu1 }
  0xa8   : > { %452 = vst.msk [vmem:[%s208_s27 + $0x10] sm:$0xff] %vm449_vm2, %v434_v53 }
  0xaf   : > { %v436_v54 = vpop.f32.mrf.mxu1 }
  0xb0   : > { %453 = vst.msk [vmem:[%s208_s27 + $0x18] sm:$0xff] %vm449_vm2, %v436_v54 }
  0xb7   : > { %v439_v55 = vpop.f32.mrf.mxu2 }
  0xb8   : > { %454 = vst.msk [vmem:[%s208_s27 + $0x20] sm:$0xff] %vm449_vm2, %v439_v55 }
  0xbf   : > { %v441_v56 = vpop.f32.mrf.mxu2 }
  0xc0   : > { %455 = vst.msk [vmem:[%s208_s27 + $0x28] sm:$0xff] %vm449_vm2, %v441_v56 }
  0xc1   : > { %v444_v57 = vpop.f32.mrf.mxu3 }
  0xc2   : > { %456 = vst.msk [vmem:[%s208_s27 + $0x30] sm:$0xff] %vm449_vm2, %v444_v57 }
  0xc9   : > { %v446_v58 = vpop.f32.mrf.mxu3 }
  0xca   : > { %457 = vst.msk [vmem:[%s208_s27 + $0x38] sm:$0xff] %vm449_vm2, %v446_v58 }
  0xcb PF: > { %s13_s14 = sadd.s32 1, %s690_s14   ;;  %s857_s12 = smov %s686_s13 }
  0xcc   : > { %p10_p5 = scmp.ge.s32.totalorder %s13_s14, 4   ;;  %s858_s13 = smov %s860_s15 }
  0xce   :  { %12 = sbr.rel (!%p10_p5) target bundleno = 2 (0x2), region = 62 }

</bundles_post_ra>
